<compile_context>
chip_gen: v7x
topology: tpu7x:2x2x1
jax: 0.10.0
libtpu: 0.0.40
codegen_flags: <defaults>
</compile_context>

<pallas_src>
import functools
import math

import jax
import jax.numpy as jnp
from jax.experimental import pallas as pl
from jax.experimental.pallas import tpu as pltpu


_BLOCK_TARGET_BYTES = 4 * 1024 * 1024   # padded in+out bytes per grid step
_BLOCK_MIN_BYTES = 1 * 1024 * 1024      # don't shrink blocks below this for step count
_MIN_PIPELINE_STEPS = 8                 # preferred pipeline depth


@functools.lru_cache(maxsize=None)
def _vmem_limit_bytes():
    """Generation-aware scoped-VMEM limit (~half of physical VMEM)."""
    cap = 64 * 1024 * 1024  # conservative default (v7x physical VMEM)
    try:
        info = pltpu.get_tpu_info()
        cap = int(getattr(info, "vmem_capacity_bytes", cap)) or cap
    except Exception:
        pass
    # v5e/v6e (128 MiB) -> 64 MiB limit; v7x (64 MiB) -> 32 MiB limit.
    return min(cap // 2, 64 * 1024 * 1024)


def _round_up(x, m):
    return -(-x // m) * m


def _sublane(dtype):
    # 8 sublanes for 32-bit dtypes, 16 for 16-bit, 32 for 8-bit (packed).
    return max(8, 32 // jnp.dtype(dtype).itemsize)


# ---------------------------------------------------------------------------
# Kernel
# ---------------------------------------------------------------------------

def _swap_minor_kernel(x_ref, o_ref):
    """(bb, tp, tq) -> (bb, tq, tp): transpose the two minor axes of the block."""
    o_ref[...] = jnp.swapaxes(x_ref[...], 1, 2)


# ---------------------------------------------------------------------------
# Tiling selection
# ---------------------------------------------------------------------------

def _choose_minor_swap_tiling(N, P, Q, dtype, budget_bytes):
    """Pick (bb, tp, tq) block sizes for the (N, P, Q) -> (N, Q, P) transpose."""
    item = jnp.dtype(dtype).itemsize
    sub = _sublane(dtype)

    def padded_block_bytes(bb, tp, tq):
        # Input block (bb, tp, tq) + output block (bb, tq, tp), each laid out in
        # VMEM with the last dim padded to 128 lanes and the second-to-last
        # padded to `sub` sublanes (this is what actually occupies VMEM, which
        # matters a lot for small channel counts like C=4).
        in_elems = bb * _round_up(tp, sub) * _round_up(tq, 128)
        out_elems = bb * _round_up(tq, sub) * _round_up(tp, 128)
        return (in_elems + out_elems) * item

    def minor_tiles(d):
        # Either the full extent, or lane-dense multiples of 128 (powers of two);
        # both satisfy the (8, 128) block-shape constraint on input and output.
        tiles = {d}
        t = 128
        while t < d:
            tiles.add(t)
            t *= 2
        return sorted(tiles)

    def lead_tiles(n):
        tiles = {n}
        d = 1
        while d * d <= n:
            if n % d == 0:
                tiles.add(d)
                tiles.add(n // d)
            d += 1
        t = 1
        while t < n:
            tiles.add(t)
            t *= 2
        return sorted(tiles)

    candidates = []
    for tq in minor_tiles(Q):
        for tp in minor_tiles(P):
            for bb in lead_tiles(N):
                blk = padded_block_bytes(bb, tp, tq)
                if 2 * blk > budget_bytes:      # pipeline double-buffers each block
                    continue
                steps = pl.cdiv(N, bb) * pl.cdiv(P, tp) * pl.cdiv(Q, tq)
                candidates.append((bb, tp, tq, blk, steps))
    if not candidates:
        return None

    multi = [c for c in candidates if c[4] >= 2]
    max_blk_ref = max(c[3] for c in (multi if multi else candidates))
    blk_floor = min(_BLOCK_MIN_BYTES, max_blk_ref)

    def key(c):
        bb, tp, tq, blk, steps = c
        return (
            steps >= 2,                        # use both v7x TensorCores (megacore)
            blk >= blk_floor,                  # don't shrink below ~1 MiB for depth
            steps >= _MIN_PIPELINE_STEPS,      # enough depth to hide DMA latency
            -abs(blk - _BLOCK_TARGET_BYTES),   # prefer ~4 MiB padded blocks
            -steps,                            # then amortize per-step overhead
            bb,                                # deterministic tie-breaks
            tp,
        )

    bb, tp, tq, _, _ = max(candidates, key=key)
    return bb, tp, tq


# ---------------------------------------------------------------------------
# Pallas wrapper for the 3D minor-axes transpose
# ---------------------------------------------------------------------------

def _transpose_minor_pallas(x3):
    """jnp.swapaxes(x3, 1, 2) for a 3D array, as a tiled Pallas kernel."""
    N, P, Q = x3.shape
    vmem_limit = _vmem_limit_bytes()
    tiling = _choose_minor_swap_tiling(N, P, Q, x3.dtype, vmem_limit // 2)
    if tiling is None:
        # Unreachable in practice (the minimum tile always fits); stay safe.
        return jnp.swapaxes(x3, 1, 2)
    bb, tp, tq = tiling

    grid = (pl.cdiv(N, bb), pl.cdiv(P, tp), pl.cdiv(Q, tq))
    # TODO(synk): for very small Q (e.g. C=4) a packed variant (pltpu.bitcast of
    # consecutive channels into wider words) would raise lane utilization of the
    # XLU transpose; left as a follow-up.
    # TODO(synk): sweep pipeline_mode=pl.Buffered(3) on the input spec once the
    # grid is deep, if DMA latency is still exposed.
    return pl.pallas_call(
        _swap_minor_kernel,
        out_shape=jax.ShapeDtypeStruct((N, Q, P), x3.dtype),
        grid=grid,
        in_specs=[pl.BlockSpec((bb, tp, tq), lambda i, j, k: (i, j, k))],
        out_specs=pl.BlockSpec((bb, tq, tp), lambda i, j, k: (i, k, j)),
        compiler_params=pltpu.CompilerParams(
            dimension_semantics=("parallel", "parallel", "parallel"),
            vmem_limit_bytes=vmem_limit,
        ),
    )(x3)


# ---------------------------------------------------------------------------
# Permutation dispatcher
# ---------------------------------------------------------------------------

def _reduce_to_minor_swap(shape, perm):
    """If `perm` keeps a leading group of axes fixed and swaps two adjacent
    contiguous groups (order preserved inside each group), return (N, P, Q) such
    that transpose(x, perm) == swapaxes(x.reshape(N, P, Q), 1, 2).reshape(out).
    Otherwise return None."""
    n = len(perm)
    for a in range(n - 1):
        if perm[:a] != tuple(range(a)):
            continue
        for m in range(1, n - a):
            expected = tuple(range(a + m, n)) + tuple(range(a, a + m))
            if perm[a:] == expected:
                N = math.prod(shape[:a]) if a > 0 else 1
                P = math.prod(shape[a:a + m])
                Q = math.prod(shape[a + m:])
                return N, P, Q
    return None


def permute_channels_pallas(x, perm):
    """Equivalent of permute_channels(B, C, H, W).forward(x) with perm=(B, C, H, W)."""
    perm = tuple(int(p) for p in perm)
    assert x.ndim == len(perm) and sorted(perm) == list(range(x.ndim))

    if perm == tuple(range(x.ndim)):
        return x  # identity (torch.permute would return a view)

    in_shape = x.shape
    out_shape = tuple(in_shape[p] for p in perm)

    reduced = _reduce_to_minor_swap(in_shape, perm)
    if reduced is not None:
        N, P, Q = reduced
        x3 = x.reshape(N, P, Q)  # free view: only collapses adjacent dims
        return _transpose_minor_pallas(x3).reshape(out_shape)

    # TODO(synk): permutations that are not a single adjacent-group swap (e.g.
    # (0, 2, 1, 3)) would need an in-kernel 4D relayout or two chained
    # minor-swap kernels (2x HBM traffic); CCVPE never hits this path, so it
    # defers to XLA's transpose.
    return jnp.transpose(x, perm)


if __name__ == "__main__":
    key = jax.random.PRNGKey(0)
    # Small NHWC input consistent with the module: batch=2, H=16, W=16, C=4.
    x = jax.random.normal(key, (2, 16, 16, 4), dtype=jnp.float32)

    # NHWC -> NCHW (permute_channels(0, 3, 1, 2)) -- lane-dense output (H*W=256).
    perm = (0, 3, 1, 2)
    out = jax.block_until_ready(permute_channels_pallas(x, perm))
    ref = jnp.transpose(x, perm)
    assert out.shape == ref.shape == (2, 4, 16, 16)
    assert jnp.array_equal(out, ref)

    # NCHW -> NHWC (reverse direction).
    out2 = jax.block_until_ready(permute_channels_pallas(ref, (0, 2, 3, 1)))
    assert out2.shape == (2, 16, 16, 4)
    assert jnp.array_equal(out2, x)

    # Minor-axes swap (leading group of two axes kept fixed).
    out3 = jax.block_until_ready(permute_channels_pallas(x, (0, 1, 3, 2)))
    assert jnp.array_equal(out3, jnp.transpose(x, (0, 1, 3, 2)))

    # Batch-rotation (channels-to-front): reduces to a pure 2D transpose.
    out4 = jax.block_until_ready(permute_channels_pallas(x, (3, 0, 1, 2)))
    assert jnp.array_equal(out4, jnp.transpose(x, (3, 0, 1, 2)))

    print("KERNEL_OK")
</pallas_src>

<mosaic_0001>
module attributes {stable_mosaic.version = 11 : i64} {
  func.func @_swap_minor_kernel(%arg0: i32, %arg1: i32, %arg2: i32, %arg3: memref<2x128x4xf32, #tpu.memory_space<vmem>>, %arg4: memref<2x4x128xf32, #tpu.memory_space<vmem>>) attributes {dimension_semantics = [#tpu.dimension_semantics<parallel>, #tpu.dimension_semantics<parallel>, #tpu.dimension_semantics<parallel>], iteration_bounds = array<i64: 1, 2, 1>, scalar_prefetch = 0 : i64, scratch_operands = 0 : i64, tpu.core_type = #tpu.core_type<tc>, window_params = [{transform_indices = @transform_0, window_bounds = array<i64: 2, 128, 4>}, {transform_indices = @transform_1, window_bounds = array<i64: 2, 4, 128>}]} {
    %c0 = arith.constant 0 : index
    %c0_0 = arith.constant 0 : index
    %c0_1 = arith.constant 0 : index
    %0 = vector.load %arg3[%c0, %c0_0, %c0_1] : memref<2x128x4xf32, #tpu.memory_space<vmem>>, vector<2x128x4xf32>
    %1 = tpu.transpose %0, [0, 2, 1] : vector<2x128x4xf32> -> vector<2x4x128xf32>
    %c0_2 = arith.constant 0 : index
    %c0_3 = arith.constant 0 : index
    %c0_4 = arith.constant 0 : index
    %2 = vector.load %arg4[%c0_2, %c0_3, %c0_4] : memref<2x4x128xf32, #tpu.memory_space<vmem>>, vector<2x4x128xf32>
    tpu.vector_store %arg4[%c0_2, %c0_3, %c0_4], %1 {strides = array<i32>} : memref<2x4x128xf32, #tpu.memory_space<vmem>>, vector<2x4x128xf32>,
    return
  }
  func.func @transform_0(%arg0: i32, %arg1: i32, %arg2: i32) -> (i32, i32, i32) {
    %c0_i32 = arith.constant 0 : i32
    return %arg0, %arg1, %arg2 : i32, i32, i32
  }
  func.func @transform_1(%arg0: i32, %arg1: i32, %arg2: i32) -> (i32, i32, i32) {
    %c0_i32 = arith.constant 0 : i32
    return %arg0, %arg2, %arg1 : i32, i32, i32
  }
}

</mosaic_0001>

<bundles_post_ra>
// kernel: tpu_custom_call.1
= control target key start
LH: loop header
LB: loop body
LE: loop exit
PB: predicated region body
PF: predicated region fallthrough
CT: control target
= control target key end

     0   :  { %6 = vsyncpa [#allocation4], 0  ;;  %s904_s0 = inlined_call_operand.vmem [shape: f32[2,256,4], index: 0, kind: input, shape index: {}]   ;;  %s905_s1 = inlined_call_operand.hbm [shape: f32[2,4,256], index: 1, kind: output, shape index: {}]  }
   0x1   :  { %8 = vsyncpa [#allocation4 + $0x1], 0  ;;  %s678_s6 = smov 0   ;;  %s680_s7 = smov 0  }
   0x2   :  { %s682_s8 = smov 0   ;;  %s684_s9 = smov 0  }
   0x3   :  { %s686_s10 = smov 0   ;;  %s688_s11 = smov 0  }
   0x4 LB: > { %s511_s12 = sadd.s32 4294967295, %s662_s11   ;;  %s512_s13 = sadd.s32 4294967294, %s662_s11   ;;  %s662_s11 = sphi %s688_s11, %s14_s11   ;;  %s658_s10 = sphi %s686_s10, %s912_s10   ;;  %s654_s9 = sphi %s684_s9, %s911_s9   ;;  %s650_s8 = sphi %s682_s8, %s910_s8   ;;  %s646_s7 = sphi %s680_s7, %s909_s7   ;;  %s642_s6 = sphi %s678_s6, %s908_s6  }
   0x5   : > { %s29_s14 = sadd.s32 1, %s658_s10  ;;  %s44_s15 = sadd.s32 1, %s650_s8 }
   0x6   : > { %p31_p0 = scmp.ge.s32.totalorder %s29_s14, 2  ;;  %p51_p1 = scmp.ne.s32.totalorder %s650_s8, %s646_s7 }
   0x7   : > { %p52_p2 = scmp.eq.s32.totalorder %s662_s11, 0  ;;  %p85_p3 = scmp.eq.s32.totalorder %s511_s12, 1 }
   0x8   : > { %s914_s14 = smov (%p31_p0, %s29_s14), 0  ;;  %p90_p6 = scmp.ne.s32.totalorder %s646_s7, %s642_s6 }
   0x9   : > { %p53_p4 = por %p52_p2, %p51_p1  ;;  %p717_p5 = por %p85_p3, %p51_p1 }
   0xa   : > { %s38_s17 = ssub.s32 %s658_s10, %s914_s14  ;;  %p91_p8 = scmp.eq.s32.totalorder %s512_s13, 1 }
   0xb   : > { %p42_p7 = scmp.eq.s32.totalorder %s38_s17, 0  ;;  %p514_p10 = scmp.ge.s32.totalorder %s662_s11, 2 }
   0xc   : > { %p728_p9 = por %p91_p8, %p90_p6 }
   0xd   : > { %s726_s18 = scalar_select %p42_p7, %s650_s8, %s44_s15  }
   0xe   : > { %107 = sbr.rel (%p514_p10) target bundleno = 41 (0x29), region = 16 }
  0x15   : > { %110 = sbr.rel (!%p53_p4) target bundleno = 41 (0x29), region = 20  ;;  %s112_s20 = sand.u32 (%p53_p4), 1, %s650_s8  }
  0x16   : > { %s525_s21 = sshll.u32 (%p53_p4), %s658_s10, 7  ;;  %s515_s22 = sshll.u32 (%p53_p4), %s112_s20, 8 }
  0x17   : > { %s740_s25 = scalar_lea.vmem (%p53_p4), %s904_s0, %s525_s21  ;;  %s745_s26 = scalar_lea.vmem (%p53_p4), [#allocation2], %s515_s22 }
  0x18   : > { %v211_v0 = vld [vmem:[%s740_s25] sm:$0xff] (%p53_p4)  ;;  %v213_v1 = vld [vmem:[%s740_s25 + $0x8] sm:$0xff] (%p53_p4)  ;;  %v215_v2 = vld [vmem:[%s740_s25 + $0x10] sm:$0xff] (%p53_p4) }
  0x19   : > { %212 = vst [vmem:[%s745_s26] sm:$0xff] (%p53_p4), %v211_v0  ;;  %214 = vst [vmem:[%s745_s26 + $0x8] sm:$0xff] (%p53_p4), %v213_v1  ;;  %v217_v3 = vld [vmem:[%s740_s25 + $0x18] sm:$0xff] (%p53_p4)  ;;  %v219_v4 = vld [vmem:[%s740_s25 + $0x20] sm:$0xff] (%p53_p4) }
  0x1a   : > { %216 = vst [vmem:[%s745_s26 + $0x10] sm:$0xff] (%p53_p4), %v215_v2  ;;  %v221_v5 = vld [vmem:[%s740_s25 + $0x28] sm:$0xff] (%p53_p4)  ;;  %218 = vst [vmem:[%s745_s26 + $0x18] sm:$0xff] (%p53_p4), %v217_v3  ;;  %v223_v6 = vld [vmem:[%s740_s25 + $0x30] sm:$0xff] (%p53_p4) }
  0x1b   : > { %220 = vst [vmem:[%s745_s26 + $0x20] sm:$0xff] (%p53_p4), %v219_v4  ;;  %222 = vst [vmem:[%s745_s26 + $0x28] sm:$0xff] (%p53_p4), %v221_v5  ;;  %v225_v7 = vld [vmem:[%s740_s25 + $0x38] sm:$0xff] (%p53_p4)  ;;  %v227_v8 = vld [vmem:[%s740_s25 + $0x40] sm:$0xff] (%p53_p4) }
  0x1c   : > { %224 = vst [vmem:[%s745_s26 + $0x30] sm:$0xff] %v223_v6  ;;  %226 = vst [vmem:[%s745_s26 + $0x38] sm:$0xff] %v225_v7  ;;  %v229_v9 = vld [vmem:[%s740_s25 + $0x48] sm:$0xff]  ;;  %v231_v10 = vld [vmem:[%s740_s25 + $0x50] sm:$0xff] }
  0x1d   : > { %228 = vst [vmem:[%s745_s26 + $0x40] sm:$0xff] %v227_v8  ;;  %v233_v11 = vld [vmem:[%s740_s25 + $0x58] sm:$0xff]  ;;  %230 = vst [vmem:[%s745_s26 + $0x48] sm:$0xff] %v229_v9  ;;  %v235_v12 = vld [vmem:[%s740_s25 + $0x60] sm:$0xff] }
  0x1e   : > { %232 = vst [vmem:[%s745_s26 + $0x50] sm:$0xff] %v231_v10  ;;  %234 = vst [vmem:[%s745_s26 + $0x58] sm:$0xff] %v233_v11  ;;  %v237_v13 = vld [vmem:[%s740_s25 + $0x68] sm:$0xff]  ;;  %v239_v14 = vld [vmem:[%s740_s25 + $0x70] sm:$0xff] }
  0x1f   : > { %236 = vst [vmem:[%s745_s26 + $0x60] sm:$0xff] %v235_v12  ;;  %238 = vst [vmem:[%s745_s26 + $0x68] sm:$0xff] %v237_v13  ;;  %v241_v15 = vld [vmem:[%s740_s25 + $0x78] sm:$0xff]  ;;  %v243_v16 = vld [vmem:[%s740_s25 + $0x100] sm:$0xff] }
  0x20   : > { %240 = vst [vmem:[%s745_s26 + $0x70] sm:$0xff] %v239_v14  ;;  %v245_v17 = vld [vmem:[%s740_s25 + $0x108] sm:$0xff]  ;;  %242 = vst [vmem:[%s745_s26 + $0x78] sm:$0xff] %v241_v15  ;;  %v247_v18 = vld [vmem:[%s740_s25 + $0x110] sm:$0xff] }
  0x21   : > { %244 = vst [vmem:[%s745_s26 + $0x80] sm:$0xff] %v243_v16  ;;  %246 = vst [vmem:[%s745_s26 + $0x88] sm:$0xff] %v245_v17  ;;  %v249_v19 = vld [vmem:[%s740_s25 + $0x118] sm:$0xff]  ;;  %v251_v20 = vld [vmem:[%s740_s25 + $0x120] sm:$0xff] }
  0x22   : > { %248 = vst [vmem:[%s745_s26 + $0x90] sm:$0xff] %v247_v18  ;;  %250 = vst [vmem:[%s745_s26 + $0x98] sm:$0xff] %v249_v19  ;;  %v253_v21 = vld [vmem:[%s740_s25 + $0x128] sm:$0xff]  ;;  %v255_v22 = vld [vmem:[%s740_s25 + $0x130] sm:$0xff] }
  0x23   : > { %252 = vst [vmem:[%s745_s26 + $0xa0] sm:$0xff] %v251_v20  ;;  %v257_v23 = vld [vmem:[%s740_s25 + $0x138] sm:$0xff]  ;;  %254 = vst [vmem:[%s745_s26 + $0xa8] sm:$0xff] %v253_v21  ;;  %v259_v24 = vld [vmem:[%s740_s25 + $0x140] sm:$0xff] }
  0x24   : > { %256 = vst [vmem:[%s745_s26 + $0xb0] sm:$0xff] %v255_v22  ;;  %258 = vst [vmem:[%s745_s26 + $0xb8] sm:$0xff] %v257_v23  ;;  %v261_v25 = vld [vmem:[%s740_s25 + $0x148] sm:$0xff]  ;;  %v263_v26 = vld [vmem:[%s740_s25 + $0x150] sm:$0xff] }
  0x25   : > { %260 = vst [vmem:[%s745_s26 + $0xc0] sm:$0xff] %v259_v24  ;;  %262 = vst [vmem:[%s745_s26 + $0xc8] sm:$0xff] %v261_v25  ;;  %v265_v27 = vld [vmem:[%s740_s25 + $0x158] sm:$0xff]  ;;  %v267_v28 = vld [vmem:[%s740_s25 + $0x160] sm:$0xff] }
  0x26   : > { %264 = vst [vmem:[%s745_s26 + $0xd0] sm:$0xff] %v263_v26  ;;  %v269_v29 = vld [vmem:[%s740_s25 + $0x168] sm:$0xff]  ;;  %266 = vst [vmem:[%s745_s26 + $0xd8] sm:$0xff] %v265_v27  ;;  %v271_v30 = vld [vmem:[%s740_s25 + $0x170] sm:$0xff] }
  0x27   : > { %268 = vst [vmem:[%s745_s26 + $0xe0] sm:$0xff] %v267_v28  ;;  %270 = vst [vmem:[%s745_s26 + $0xe8] sm:$0xff] %v269_v29  ;;  %v273_v31 = vld [vmem:[%s740_s25 + $0x178] sm:$0xff] }
  0x28   : > { %272 = vst [vmem:[%s745_s26 + $0xf0] sm:$0xff] %v271_v30  ;;  %274 = vst [vmem:[%s745_s26 + $0xf8] sm:$0xff] %v273_v31 }
  0x29 PF: > { %p518_p11 = scmp.ge.s32.totalorder %s662_s11, 1  ;;  %p279_p12 = scmp.lt.s32.totalorder %s662_s11, 3 }
  0x2b   : > { %p280_p13 = pnand %p518_p11, %p279_p12 }
  0x2c   : > { %s811_s27 = sand.u32 (!%p280_p13), 1, %s646_s7   ;;  %s522_s4 = sshll.u32 (!%p280_p13), %s654_s9, 6 }
  0x2d   : > { %283 = sbr.rel (%p280_p13) target bundleno = 194 (0xc2), region = 58  ;;  %s519_s28 = sshll.u32 (!%p280_p13), %s811_s27, 8 }
  0x2e   : > { %s814_s29 = scalar_lea.vmem (!%p280_p13), [#allocation2], %s519_s28  ;;  %s520_s30 = sshll.u32 (!%p280_p13), %s811_s27, 3 }
  0x2f   : > { %v324_v32 = vld [vmem:[%s814_s29 + $0x80] sm:$0xff] (!%p280_p13)  ;;  %v325_v34 = vld [vmem:[%s814_s29 + $0x88] sm:$0xff] (!%p280_p13)  ;;  %v326_v36 = vld [vmem:[%s814_s29 + $0x90] sm:$0xff] (!%p280_p13)  ;;  %s304_s2 = scalar_lea.vmem (!%p280_p13), [#allocation3], %s520_s30  ;;  %s855_s13 = scalar_lea.hbm (!%p280_p13), %s905_s1, %s522_s4 }
  0x30   : > { %v308_v33 = vld [vmem:[%s814_s29] sm:$0xff] (!%p280_p13)  ;;  %372 = vxpose.xlu1.b32.start [1/16] (narrow) (!%p280_p13), %v324_v32, 8  ;;  %v309_v35 = vld [vmem:[%s814_s29 + $0x8] sm:$0xff] (!%p280_p13)  ;;  %v310_v37 = vld [vmem:[%s814_s29 + $0x10] sm:$0xff] (!%p280_p13)  ;;  %s424_s3 = sshll.u32 (!%p280_p13), %s304_s2, 4  ;;  %s407_s15 = scalar_lea.sflag (!%p280_p13), [#allocation4], %s811_s27  ;;  %s850_s3 = int_to_ptr.vmem [resolvable:$true] %s424_s3 }
  0x31   : > { %340 = vxpose.xlu0.b32.start [1/16] (narrow) (!%p280_p13), %v308_v33, 8  ;;  %v327_v38 = vld [vmem:[%s814_s29 + $0x98] sm:$0xff] (!%p280_p13)  ;;  %v328_v40 = vld [vmem:[%s814_s29 + $0xa0] sm:$0xff] (!%p280_p13)  ;;  %v329_v42 = vld [vmem:[%s814_s29 + $0xa8] sm:$0xff] (!%p280_p13)  ;;  %s584_s17 = scalar_lea.vmem (!%p280_p13), %s850_s3, 128  ;;  %s664_s9 = smov (!%p280_p13), [#allocation3]  }
  0x32   : > { %v311_v39 = vld [vmem:[%s814_s29 + $0x18] sm:$0xff] (!%p280_p13)  ;;  %v312_v41 = vld [vmem:[%s814_s29 + $0x20] sm:$0xff] (!%p280_p13)  ;;  %v313_v43 = vld [vmem:[%s814_s29 + $0x28] sm:$0xff] (!%p280_p13)  ;;  %p585_p0 = scmp.ne.s32.totalorder (!%p280_p13), %s850_s3, %s584_s17  ;;  %s588_s20 = sshll.u32 (!%p280_p13), %s664_s9, 4  ;;  %s589_s20 = int_to_ptr.vmem [resolvable:$false] %s588_s20 }
  0x33   : > { %v330_v44 = vld [vmem:[%s814_s29 + $0xb0] sm:$0xff] (!%p280_p13)  ;;  %v331_v46 = vld [vmem:[%s814_s29 + $0xb8] sm:$0xff] (!%p280_p13)  ;;  %v332_v48 = vld [vmem:[%s814_s29 + $0xc0] sm:$0xff] (!%p280_p13)  ;;  %s590_s21 = scalar_lea.vmem (!%p280_p13), %s589_s20, 256  ;;  %p591_p3 = scmp.lt.s32.totalorder (!%p280_p13), %s850_s3, %s589_s20 }
  0x34   : > { %373 = vxpose.xlu1.b32.cont [2/16] (narrow) %v325_v34, 8  ;;  %v314_v45 = vld [vmem:[%s814_s29 + $0x30] sm:$0xff]  ;;  %v315_v47 = vld [vmem:[%s814_s29 + $0x38] sm:$0xff]  ;;  %v316_v49 = vld [vmem:[%s814_s29 + $0x40] sm:$0xff]  ;;  %p586_p1 = pnand %p585_p0, %p717_p5  ;;  %p592_p4 = scmp.lt.s32.totalorder %s590_s21, %s584_s17 }
  0x35   : > { %341 = vxpose.xlu0.b32.cont [2/16] (narrow) %v309_v35, 8  ;;  %v333_v50 = vld [vmem:[%s814_s29 + $0xc8] sm:$0xff]  ;;  %v334_v52 = vld [vmem:[%s814_s29 + $0xd0] sm:$0xff]  ;;  %v335_v54 = vld [vmem:[%s814_s29 + $0xd8] sm:$0xff] }
  0x36   : > { %v317_v51 = vld [vmem:[%s814_s29 + $0x48] sm:$0xff]  ;;  %v318_v53 = vld [vmem:[%s814_s29 + $0x50] sm:$0xff]  ;;  %v319_v55 = vld [vmem:[%s814_s29 + $0x58] sm:$0xff]  ;;  %p587_p2 = pneg %p586_p1  ;;  %p593_p6 = por %p592_p4, %p591_p3 }
  0x37   : > { %v336_v56 = vld [vmem:[%s814_s29 + $0xe0] sm:$0xff]  ;;  %v337_v58 = vld [vmem:[%s814_s29 + $0xe8] sm:$0xff]  ;;  %v338_v60 = vld [vmem:[%s814_s29 + $0xf0] sm:$0xff] }
  0x38   : > { %374 = vxpose.xlu1.b32.cont [3/16] (narrow) %v326_v36, 8  ;;  %v320_v57 = vld [vmem:[%s814_s29 + $0x60] sm:$0xff]  ;;  %v321_v59 = vld [vmem:[%s814_s29 + $0x68] sm:$0xff]  ;;  %v322_v61 = vld [vmem:[%s814_s29 + $0x70] sm:$0xff]  ;;  %p594_p7 = pnand %p593_p6, %p587_p2 }
  0x39   : > { %342 = vxpose.xlu0.b32.cont [3/16] (narrow) %v310_v37, 8  ;;  %v339_v62 = vld [vmem:[%s814_s29 + $0xf8] sm:$0xff] }
  0x3a   : > { %v323_v63 = vld [vmem:[%s814_s29 + $0x78] sm:$0xff] }
  0x3c   : > { %375 = vxpose.xlu1.b32.cont [4/16] (narrow) %v327_v38, 8 }
  0x3d   : > { %343 = vxpose.xlu0.b32.cont [4/16] (narrow) %v311_v39, 8 }
  0x40   : > { %376 = vxpose.xlu1.b32.cont [5/16] (narrow) %v328_v40, 8 }
  0x41   : > { %344 = vxpose.xlu0.b32.cont [5/16] (narrow) %v312_v41, 8 }
  0x44   : > { %377 = vxpose.xlu1.b32.cont [6/16] (narrow) %v329_v42, 8 }
  0x45   : > { %345 = vxpose.xlu0.b32.cont [6/16] (narrow) %v313_v43, 8 }
  0x48   : > { %378 = vxpose.xlu1.b32.cont [7/16] (narrow) %v330_v44, 8 }
  0x49   : > { %346 = vxpose.xlu0.b32.cont [7/16] (narrow) %v314_v45, 8 }
  0x4c   : > { %379 = vxpose.xlu1.b32.cont [8/16] (narrow) %v331_v46, 8 }
  0x4d   : > { %347 = vxpose.xlu0.b32.cont [8/16] (narrow) %v315_v47, 8 }
  0x50   : > { %380 = vxpose.xlu1.b32.cont [9/16] (narrow) %v332_v48, 8 }
  0x51   : > { %348 = vxpose.xlu0.b32.cont [9/16] (narrow) %v316_v49, 8 }
  0x54   : > { %381 = vxpose.xlu1.b32.cont [10/16] (narrow) %v333_v50, 8 }
  0x55   : > { %349 = vxpose.xlu0.b32.cont [10/16] (narrow) %v317_v51, 8 }
  0x58   : > { %382 = vxpose.xlu1.b32.cont [11/16] (narrow) %v334_v52, 8 }
  0x59   : > { %350 = vxpose.xlu0.b32.cont [11/16] (narrow) %v318_v53, 8 }
  0x5c   : > { %383 = vxpose.xlu1.b32.cont [12/16] (narrow) %v335_v54, 8 }
  0x5d   : > { %351 = vxpose.xlu0.b32.cont [12/16] (narrow) %v319_v55, 8 }
  0x60   : > { %384 = vxpose.xlu1.b32.cont [13/16] (narrow) %v336_v56, 8 }
  0x61   : > { %352 = vxpose.xlu0.b32.cont [13/16] (narrow) %v320_v57, 8 }
  0x64   : > { %385 = vxpose.xlu1.b32.cont [14/16] (narrow) %v337_v58, 8 }
  0x65   : > { %353 = vxpose.xlu0.b32.cont [14/16] (narrow) %v321_v59, 8 }
  0x68   : > { %386 = vxpose.xlu1.b32.cont [15/16] (narrow) %v338_v60, 8 }
  0x69   : > { %354 = vxpose.xlu0.b32.cont [15/16] (narrow) %v322_v61, 8 }
  0x6c   : > { %387 = vxpose.xlu1.b32.end [16/16] (narrow) %v339_v62, 8 }
  0x6d   : > { %355 = vxpose.xlu0.b32.end [16/16] (narrow) %v323_v63, 8 }
  0xb0   : > { %v388_v0 = vpop.trf.xlu1 }
  0xb1   : > { %v356_v1 = vpop.trf.xlu0  ;;  %405 = vst [vmem:[%s304_s2 + $0x4] sm:$0xf] %v388_v0 }
  0xb2   : > { %404 = vst [vmem:[%s304_s2] sm:$0xf] %v356_v1 }
  0xb3   : > { %597 = shalt.err (!%p594_p7)
}
  0xb4   : > { %s598_s22 = scalar_lea.hbm %s855_s13, 128  ;;  %s602_s25 = scalar_lea.hbm %s905_s1, 256 }
  0xb5   : > { %p599_p8 = scmp.ne.s32.totalorder %s855_s13, %s598_s22  ;;  %p603_p13 = scmp.lt.u32.totalorder %s855_s13, %s905_s1 }
  0xb6   : > { %p604_p0 = scmp.lt.u32.totalorder %s602_s25, %s598_s22  ;;  %p606_p2 = scmp.lt.u32.totalorder %s598_s22, %s855_s13 }
  0xb7   : > { %p600_p11 = pnand %p599_p8, %p717_p5 }
  0xb8   : > { %p605_p1 = por %p604_p0, %p603_p13 }
  0xb9   : > { %p601_p12 = pneg %p600_p11 }
  0xba   : > { %p607_p3 = por %p606_p2, %p605_p1 }
  0xbc   : > { %p608_p4 = pnand %p607_p3, %p601_p12 }
  0xbe   : > { %611 = shalt.err (!%p608_p4)
}
  0xbf   : > { %s665_s29 = smov 64   ;;  %s666_s30 = smov 128  }
  0xc0   : > { %s667_s2 = smov 4  }
  0xc1   : > { %526 = dma.vmem_to_hbm [thread:$0]  (%p717_p5), %s850_s3, 128, %s855_s13, %s407_s15, %s665_s29, %s666_s30, %s667_s2  }
  0xc2 PF: > { %s439_s4 = sand.u32 1, %s642_s6   ;;  %p529_p6 = pnand %p514_p10, %p728_p9 }
  0xc3   : > { %s440_s5 = scalar_lea.sflag [#allocation4], %s439_s4 }
  0xc4   : > { %637 = dma.done.wait (!%p529_p6), %s440_s5, 128  }
  0xc5   : > { %639 = vsyncadd (!%p529_p6), %s440_s5, 4294967168  ;;  %s14_s11 = sadd.s32 1, %s662_s11   ;;  %s908_s6 = smov %s646_s7 }
  0xc6   : > { %p11_p7 = scmp.ge.s32.totalorder %s14_s11, 4   ;;  %s909_s7 = smov %s650_s8 }
  0xc7   : > { %s910_s8 = smov %s726_s18  ;;  %s911_s9 = smov %s658_s10 }
  0xc8   : > { %s912_s10 = smov %s914_s14  ;;  %13 = sbr.rel (!%p11_p7) target bundleno = 4 (0x4), region = 102 }
  0xcf   :  { %445 = vsyncpa [#allocation4], 1 }
  0xd0   :  { %447 = vsyncpa [#allocation4 + $0x1], 1 }

</bundles_post_ra>
